<compile_context>
chip_gen: v7x
topology: tpu7x:2x2x1
jax: 0.10.0
libtpu: 0.0.40
codegen_flags: <defaults>
</compile_context>

<pallas_src>
import functools

import jax
import jax.numpy as jnp
from jax.experimental import pallas as pl
from jax.experimental.pallas import tpu as pltpu


def _mlp_kernel(x_ref, w1_ref, b1_ref, w2_ref, b2_ref, w3_ref, b3_ref, o_ref):
    # fc1 + ReLU  (MXU matmul, f32 accumulate)
    h1 = jnp.dot(x_ref[...], w1_ref[...], preferred_element_type=jnp.float32)
    h1 = jnp.maximum(h1 + b1_ref[...].astype(jnp.float32), 0.0)
    # fc2 + ReLU.  NOTE: casting h1 to the weight dtype (e.g. bf16) is a
    # deliberate re-quantization of the activations between layers.
    h2 = jnp.dot(h1.astype(w2_ref.dtype), w2_ref[...],
                 preferred_element_type=jnp.float32)
    h2 = jnp.maximum(h2 + b2_ref[...].astype(jnp.float32), 0.0)
    # fc3 (out_features == 1): VPU multiply + cross-lane reduction instead of
    # an N=1 MXU matmul (w3 is presented as a (1, half_dim) row).
    s = jnp.sum(h2 * w3_ref[...].astype(jnp.float32), axis=-1, keepdims=True)
    o_ref[...] = (s + b3_ref[...].astype(jnp.float32)).astype(o_ref.dtype)


def _cdiv(a, b):
    return -(-a // b)


def _round_up(n, m):
    return _cdiv(n, m) * m


@functools.lru_cache(maxsize=1)
def _tpu_budget_and_is_v7():
    """Generation-aware VMEM budget (75% of per-core capacity) + v7x flag."""
    kind = ""
    try:
        kind = jax.devices()[0].device_kind.lower()
    except Exception:
        pass
    is_v7 = ("v7" in kind) or ("7x" in kind)
    try:
        vmem = int(pltpu.get_tpu_info().vmem_capacity_bytes)
    except Exception:
        vmem = (64 << 20) if is_v7 else (128 << 20)
    return int(vmem * 0.75), is_v7


@functools.partial(jax.jit, static_argnames=("block_b", "cast_to_bf16"))
def embedding2score(x, w1, b1, w2, b2, w3, b3, *, block_b=None,
                    cast_to_bf16=False):
    B, input_dim = x.shape
    hidden_dim = w1.shape[1]
    half_dim = w2.shape[1]
    out_dtype = x.dtype

    budget, is_v7 = _tpu_budget_and_is_v7()

    if cast_to_bf16:
        # Roofline lever for f32 callers: the kernel is HBM-bound on the x
        # stream, so halving its bytes ~halves wall clock.  Accumulation stays
        # f32 in-kernel and the output keeps the caller's dtype.
        x = x.astype(jnp.bfloat16)
        w1 = w1.astype(jnp.bfloat16)
        w2 = w2.astype(jnp.bfloat16)
        w3 = w3.astype(jnp.bfloat16)

    # fc3 weight as a lane-dense (1, half_dim) row for the VPU/XLU reduction.
    w3_row = w3.reshape(1, half_dim)
    b3_blk = b3.reshape(1, 1)

    # ---- VMEM budgeting ----------------------------------------------------
    weight_bytes = sum(int(a.size) * a.dtype.itemsize
                       for a in (w1, b1, w2, b2, w3_row, b3_blk))
    x_item = jnp.dtype(x.dtype).itemsize
    # Per batch row: double-buffered x stream + f32 h1/h2 intermediates (plus
    # the cast copy of h1 and the h2*w3 product, generously counted at 4 B).
    bytes_per_row = 2 * input_dim * x_item + 8 * (hidden_dim + half_dim) + 32
    avail = budget - weight_bytes - (1 << 20)          # slack: output blocks etc.
    if avail < 8 * bytes_per_row:
        # TODO(synk): K-tiled fallback (grid axis over input_dim with an f32
        # VMEM accumulator) for layers whose untiled weights exceed VMEM.
        raise ValueError(
            f"fc weights ({weight_bytes / 2**20:.1f} MiB) do not fit the VMEM "
            f"budget ({budget / 2**20:.1f} MiB); K-tiling is not implemented")
    cap_rows = min(int(avail // bytes_per_row), 2048)

    # ---- batch tile ----------------------------------------------------------
    if block_b is None:
        want_split = is_v7 and B >= 256      # engage both v7x TensorCores
        if B <= cap_rows and not want_split:
            block_b = B                      # one full block, single grid step
        else:
            tgt = cap_rows
            if want_split:
                tgt = min(tgt, _round_up(_cdiv(B, 2), 128))
            block_b = max(128, (int(tgt) // 128) * 128)
            if block_b >= B:
                block_b = B
    else:
        block_b = int(block_b)
        if block_b >= B:
            block_b = B
        elif block_b % 8 != 0:
            block_b = min(B, _round_up(block_b, 8))   # sublane multiple

    num_tiles = _cdiv(B, block_b)

    # Megacore: only CORE_PARALLEL changes codegen; use it on v7x when there
    # are >= 2 grid steps to split the batch stream across both TensorCores.
    if is_v7 and num_tiles >= 2:
        batch_sem = getattr(pltpu, "CORE_PARALLEL", "parallel")
    else:
        batch_sem = "parallel"

    # Grid-invariant operands (constant index_map): single-buffer them.
    def const_spec(shape):
        return pl.BlockSpec(shape, lambda i: (0, 0),
                            pipeline_mode=pl.Buffered(1))

    out = pl.pallas_call(
        _mlp_kernel,
        out_shape=jax.ShapeDtypeStruct((B, 1), out_dtype),
        grid_spec=pltpu.PrefetchScalarGridSpec(
            num_scalar_prefetch=0,
            grid=(num_tiles,),
            in_specs=[
                pl.BlockSpec((block_b, input_dim), lambda i: (i, 0)),  # x tile
                const_spec((input_dim, hidden_dim)),                   # W1
                const_spec((1, hidden_dim)),                           # b1
                const_spec((hidden_dim, half_dim)),                    # W2
                const_spec((1, half_dim)),                             # b2
                const_spec((1, half_dim)),                             # W3 row
                const_spec((1, 1)),                                    # b3
            ],
            out_specs=pl.BlockSpec((block_b, 1), lambda i: (i, 0)),
        ),
        compiler_params=pltpu.CompilerParams(
            dimension_semantics=(batch_sem,),
            vmem_limit_bytes=int(budget),
        ),
    )(x, w1, b1, w2, b2, w3_row, b3_blk)
    return out


def init_params(key, input_dim, hidden_dim, dtype=jnp.float32):
    """Deterministic init mimicking nn.Linear (uniform +-1/sqrt(fan_in)).

    Weights are returned already transposed to (in, out)."""
    half_dim = hidden_dim // 2
    ks = jax.random.split(key, 6)

    def lin(kw, kb, fan_in, fan_out):
        bound = 1.0 / jnp.sqrt(fan_in)
        w = jax.random.uniform(kw, (fan_in, fan_out), dtype, -bound, bound)
        b = jax.random.uniform(kb, (1, fan_out), dtype, -bound, bound)
        return w, b

    w1, b1 = lin(ks[0], ks[1], input_dim, hidden_dim)
    w2, b2 = lin(ks[2], ks[3], hidden_dim, half_dim)
    w3, b3 = lin(ks[4], ks[5], half_dim, 1)
    return w1, b1, w2, b2, w3, b3


def reference(x, w1, b1, w2, b2, w3, b3):
    h1 = jnp.maximum(x @ w1 + b1, 0.0)
    h2 = jnp.maximum(h1 @ w2 + b2, 0.0)
    return h2 @ w3 + b3


if __name__ == "__main__":
    # Small shapes consistent with the module (input_dim -> hidden -> hidden/2 -> 1)
    B, INPUT_DIM, HIDDEN_DIM = 16, 512, 256

    key = jax.random.PRNGKey(0)
    kx, kp, kx2 = jax.random.split(key, 3)
    x = jax.random.normal(kx, (B, INPUT_DIM), jnp.float32)
    params = init_params(kp, INPUT_DIM, HIDDEN_DIM)
    ref = reference(x, *params)

    # 1) f32, single-block path (strict check vs reference).
    score = jax.block_until_ready(embedding2score(x, *params))
    assert score.shape == (B, 1)
    assert jnp.allclose(score, ref, atol=1e-4, rtol=1e-4), "f32 mismatch vs reference"

    # 2) Ragged batch: no padding, one full (13, D) block.
    score2 = jax.block_until_ready(embedding2score(x[:13], *params))
    assert score2.shape == (13, 1)
    assert jnp.allclose(score2, ref[:13], atol=1e-4, rtol=1e-4), "ragged mismatch"

    # 3) Multi-tile path with a partial last block (no jnp.pad; masked writeback).
    B3 = 300
    x3 = jax.random.normal(kx2, (B3, INPUT_DIM), jnp.float32)
    ref3 = reference(x3, *params)
    score3 = jax.block_until_ready(embedding2score(x3, *params, block_b=128))
    assert score3.shape == (B3, 1)
    assert jnp.allclose(score3, ref3, atol=1e-4, rtol=1e-4), "partial-block mismatch"

    # 4) Native bf16 path (bf16 MXU on v6e/v7x; f32 accumulation inside).
    xb = x.astype(jnp.bfloat16)
    pb = tuple(p.astype(jnp.bfloat16) for p in params)
    score_bf16 = jax.block_until_ready(embedding2score(xb, *pb))
    assert score_bf16.shape == (B, 1)
    assert bool(jnp.isfinite(score_bf16.astype(jnp.float32)).all())
    assert jnp.allclose(score_bf16.astype(jnp.float32), ref, atol=0.5), "bf16 sanity"

    # 5) f32 caller opting into bf16 streaming of x/weights (HBM roofline lever).
    score_cast = jax.block_until_ready(embedding2score(x, *params, cast_to_bf16=True))
    assert score_cast.shape == (B, 1) and score_cast.dtype == x.dtype
    assert jnp.allclose(score_cast, ref, atol=0.5), "bf16-stream sanity"

    print("KERNEL_OK")
</pallas_src>

<mosaic_0001>
module attributes {stable_mosaic.version = 11 : i64} {
  func.func @_mlp_kernel(%arg0: i32, %arg1: memref<16x512xf32, #tpu.memory_space<vmem>>, %arg2: memref<512x256xf32, #tpu.memory_space<vmem>>, %arg3: memref<1x256xf32, #tpu.memory_space<vmem>>, %arg4: memref<256x128xf32, #tpu.memory_space<vmem>>, %arg5: memref<1x128xf32, #tpu.memory_space<vmem>>, %arg6: memref<1x128xf32, #tpu.memory_space<vmem>>, %arg7: memref<1x1xf32, #tpu.memory_space<vmem>>, %arg8: memref<16x1xf32, #tpu.memory_space<vmem>>) attributes {dimension_semantics = [#tpu.dimension_semantics<parallel>], iteration_bounds = array<i64: 1>, scalar_prefetch = 0 : i64, scratch_operands = 0 : i64, tpu.core_type = #tpu.core_type<tc>, window_params = [{transform_indices = @transform_0, window_bounds = array<i64: 16, 512>}, {pipeline_mode = #tpu.pipeline_mode<synchronous>, transform_indices = @transform_1, window_bounds = array<i64: 512, 256>}, {pipeline_mode = #tpu.pipeline_mode<synchronous>, transform_indices = @transform_2, window_bounds = array<i64: 1, 256>}, {pipeline_mode = #tpu.pipeline_mode<synchronous>, transform_indices = @transform_3, window_bounds = array<i64: 256, 128>}, {pipeline_mode = #tpu.pipeline_mode<synchronous>, transform_indices = @transform_4, window_bounds = array<i64: 1, 128>}, {pipeline_mode = #tpu.pipeline_mode<synchronous>, transform_indices = @transform_5, window_bounds = array<i64: 1, 128>}, {pipeline_mode = #tpu.pipeline_mode<synchronous>, transform_indices = @transform_6, window_bounds = array<i64: 1, 1>}, {transform_indices = @transform_7, window_bounds = array<i64: 16, 1>}]} {
    %c0 = arith.constant 0 : index
    %c0_0 = arith.constant 0 : index
    %0 = vector.load %arg1[%c0, %c0_0] : memref<16x512xf32, #tpu.memory_space<vmem>>, vector<16x512xf32>
    %c0_1 = arith.constant 0 : index
    %c0_2 = arith.constant 0 : index
    %1 = vector.load %arg2[%c0_1, %c0_2] : memref<512x256xf32, #tpu.memory_space<vmem>>, vector<512x256xf32>
    %cst = arith.constant dense<0.000000e+00> : vector<16x256xf32>
    %2 = tpu.matmul %0, %1, %cst {dimension_numbers = #tpu.dot_dimension_numbers<[1], [0], [0], [1], [0, 0, 1, 1], [], []>} : vector<16x512xf32>, vector<512x256xf32>, vector<16x256xf32> -> vector<16x256xf32>
    %c0_3 = arith.constant 0 : index
    %c0_4 = arith.constant 0 : index
    %3 = vector.load %arg3[%c0_3, %c0_4] : memref<1x256xf32, #tpu.memory_space<vmem>>, vector<1x256xf32>
    %4 = vector.broadcast %3 : vector<1x256xf32> to vector<16x256xf32>
    %5 = arith.addf %2, %4 : vector<16x256xf32>
    %cst_5 = arith.constant 0.000000e+00 : f32
    %6 = vector.broadcast %cst_5 : f32 to vector<16x256xf32>
    %7 = arith.maximumf %5, %6 : vector<16x256xf32>
    %c0_6 = arith.constant 0 : index
    %c0_7 = arith.constant 0 : index
    %8 = vector.load %arg4[%c0_6, %c0_7] : memref<256x128xf32, #tpu.memory_space<vmem>>, vector<256x128xf32>
    %cst_8 = arith.constant dense<0.000000e+00> : vector<16x128xf32>
    %9 = tpu.matmul %7, %8, %cst_8 {dimension_numbers = #tpu.dot_dimension_numbers<[1], [0], [0], [1], [0, 0, 1, 1], [], []>} : vector<16x256xf32>, vector<256x128xf32>, vector<16x128xf32> -> vector<16x128xf32>
    %c0_9 = arith.constant 0 : index
    %c0_10 = arith.constant 0 : index
    %10 = vector.load %arg5[%c0_9, %c0_10] : memref<1x128xf32, #tpu.memory_space<vmem>>, vector<1x128xf32>
    %11 = vector.broadcast %10 : vector<1x128xf32> to vector<16x128xf32>
    %12 = arith.addf %9, %11 : vector<16x128xf32>
    %cst_11 = arith.constant 0.000000e+00 : f32
    %13 = vector.broadcast %cst_11 : f32 to vector<16x128xf32>
    %14 = arith.maximumf %12, %13 : vector<16x128xf32>
    %c0_12 = arith.constant 0 : index
    %c0_13 = arith.constant 0 : index
    %15 = vector.load %arg6[%c0_12, %c0_13] : memref<1x128xf32, #tpu.memory_space<vmem>>, vector<1x128xf32>
    %16 = vector.broadcast %15 : vector<1x128xf32> to vector<16x128xf32>
    %17 = arith.mulf %14, %16 : vector<16x128xf32>
    %cst_14 = arith.constant dense<0.000000e+00> : vector<16xf32>
    %18 = vector.multi_reduction <add>, %17, %cst_14 [1] : vector<16x128xf32> to vector<16xf32>
    %19 = vector.shape_cast %18 : vector<16xf32> to vector<16x1xf32>
    %c0_15 = arith.constant 0 : index
    %c0_16 = arith.constant 0 : index
    %20 = vector.load %arg7[%c0_15, %c0_16] : memref<1x1xf32, #tpu.memory_space<vmem>>, vector<1x1xf32>
    %21 = vector.broadcast %20 : vector<1x1xf32> to vector<16x1xf32>
    %22 = arith.addf %19, %21 : vector<16x1xf32>
    %c0_17 = arith.constant 0 : index
    %c0_18 = arith.constant 0 : index
    %23 = vector.load %arg8[%c0_17, %c0_18] : memref<16x1xf32, #tpu.memory_space<vmem>>, vector<16x1xf32>
    tpu.vector_store %arg8[%c0_17, %c0_18], %22 {strides = array<i32>} : memref<16x1xf32, #tpu.memory_space<vmem>>, vector<16x1xf32>,
    return
  }
  func.func @transform_0(%arg0: i32) -> (i32, i32) {
    %c0_i32 = arith.constant 0 : i32
    %c0_i32_0 = arith.constant 0 : i32
    return %arg0, %c0_i32 : i32, i32
  }
  func.func @transform_1(%arg0: i32) -> (i32, i32) {
    %c0_i32 = arith.constant 0 : i32
    %c0_i32_0 = arith.constant 0 : i32
    %c0_i32_1 = arith.constant 0 : i32
    return %c0_i32, %c0_i32_0 : i32, i32
  }
  func.func @transform_2(%arg0: i32) -> (i32, i32) {
    %c0_i32 = arith.constant 0 : i32
    %c0_i32_0 = arith.constant 0 : i32
    %c0_i32_1 = arith.constant 0 : i32
    return %c0_i32, %c0_i32_0 : i32, i32
  }
  func.func @transform_3(%arg0: i32) -> (i32, i32) {
    %c0_i32 = arith.constant 0 : i32
    %c0_i32_0 = arith.constant 0 : i32
    %c0_i32_1 = arith.constant 0 : i32
    return %c0_i32, %c0_i32_0 : i32, i32
  }
  func.func @transform_4(%arg0: i32) -> (i32, i32) {
    %c0_i32 = arith.constant 0 : i32
    %c0_i32_0 = arith.constant 0 : i32
    %c0_i32_1 = arith.constant 0 : i32
    return %c0_i32, %c0_i32_0 : i32, i32
  }
  func.func @transform_5(%arg0: i32) -> (i32, i32) {
    %c0_i32 = arith.constant 0 : i32
    %c0_i32_0 = arith.constant 0 : i32
    %c0_i32_1 = arith.constant 0 : i32
    return %c0_i32, %c0_i32_0 : i32, i32
  }
  func.func @transform_6(%arg0: i32) -> (i32, i32) {
    %c0_i32 = arith.constant 0 : i32
    %c0_i32_0 = arith.constant 0 : i32
    %c0_i32_1 = arith.constant 0 : i32
    return %c0_i32, %c0_i32_0 : i32, i32
  }
  func.func @transform_7(%arg0: i32) -> (i32, i32) {
    %c0_i32 = arith.constant 0 : i32
    %c0_i32_0 = arith.constant 0 : i32
    return %arg0, %c0_i32 : i32, i32
  }
}

</mosaic_0001>

<bundles_post_ra>
// kernel: embedding2score.1
= control target key start
LH: loop header
LB: loop body
LE: loop exit
PB: predicated region body
PF: predicated region fallthrough
CT: control target
= control target key end

     0   :  { %s1120_s0 = inlined_call_operand.hbm [shape: f32[16,512], index: 0, kind: input, shape index: {}]   ;;  %s1121_s1 = inlined_call_operand.hbm [shape: f32[512,256], index: 1, kind: input, shape index: {}]   ;;  %s1122_s2 = inlined_call_operand.hbm [shape: f32[1,256], index: 2, kind: input, shape index: {}]   ;;  %s1123_s3 = inlined_call_operand.hbm [shape: f32[256,128], index: 3, kind: input, shape index: {}]   ;;  %s1124_s4 = inlined_call_operand.hbm [shape: f32[1,128], index: 4, kind: input, shape index: {}]   ;;  %s1125_s5 = inlined_call_operand.hbm [shape: f32[1,128], index: 5, kind: input, shape index: {}]   ;;  %s1126_s6 = inlined_call_operand.<no memory space> [shape: f32[1,1], index: 6, kind: input, shape index: {}]   ;;  %s1127_s7 = inlined_call_operand.hbm [shape: f32[16,1], index: 7, kind: output, shape index: {}]  }
   0x1   :  { %v12_v0 = vstv %s1126_s6 }
   0x2   :  { %13 = vst [vmem:[#allocation2] sm:$0x1] %v12_v0 }
   0x3   :  { %14 = vsyncpa [#allocation4], 0 }
   0x4   :  { %15 = vsyncpa [#allocation7], 0 }
   0x5   :  { %16 = vsyncpa [#allocation10], 0 }
   0x6   :  { %17 = vsyncpa [#allocation13], 0 }
   0x7   :  { %18 = vsyncpa [#allocation5], 0  ;;  %s974_s26 = smov [#allocation6]   ;;  %s810_s30 = scalar_lea.hbm %s1121_s1, 16384 }
   0x8   :  { %s36_s27 = sshll.u32 %s974_s26, 4  ;;  %p811_p0 = scmp.ne.s32.totalorder %s1121_s1, %s810_s30  ;;  %s37_s27 = int_to_ptr.vmem [resolvable:$true] %s36_s27 }
   0x9   :  { %p814_p1 = scmp.lt.u32.totalorder %s810_s30, %s1121_s1 }
   0xb   :  { %p816_p2 = pnand %p814_p1, %p811_p0 }
   0xd   :  { %819 = shalt.err (!%p816_p2)
}
   0xe   :  { %s820_s6 = scalar_lea.vmem %s37_s27, 16384  ;;  %p825_p4 = scmp.lt.s32.totalorder %s37_s27, %s37_s27 }
   0xf   :  { %p821_p3 = scmp.ne.s32.totalorder %s37_s27, %s820_s6  ;;  %p826_p5 = scmp.lt.s32.totalorder %s820_s6, %s820_s6 }
  0x11   :  { %p827_p6 = por %p826_p5, %p825_p4 }
  0x13   :  { %p828_p7 = pnand %p827_p6, %p821_p3 }
  0x15   :  { %831 = shalt.err (!%p828_p7)
}
  0x16   :  { %s975_s12 = smov 256   ;;  %s976_s13 = smov 16  }
  0x17   :  { %42 = dma.hbm_to_vmem [thread:$0]  %s1121_s1, 16384, %s37_s27, [#allocation7], %s975_s12, %s975_s12, %s976_s13  }
  0x18   :  { %s977_s16 = smov [#allocation9]   ;;  %s832_s20 = scalar_lea.hbm %s1123_s3, 4096 }
  0x19   :  { %s58_s17 = sshll.u32 %s977_s16, 4  ;;  %p833_p8 = scmp.ne.s32.totalorder %s1123_s3, %s832_s20  ;;  %s59_s17 = int_to_ptr.vmem [resolvable:$true] %s58_s17 }
  0x1a   :  { %p836_p9 = scmp.lt.u32.totalorder %s832_s20, %s1123_s3 }
  0x1c   :  { %p838_p10 = pnand %p836_p9, %p833_p8 }
  0x1e   :  { %841 = shalt.err (!%p838_p10)
}
  0x1f   :  { %s842_s25 = scalar_lea.vmem %s59_s17, 4096  ;;  %p847_p12 = scmp.lt.s32.totalorder %s59_s17, %s59_s17 }
  0x20   :  { %p843_p11 = scmp.ne.s32.totalorder %s59_s17, %s842_s25  ;;  %p848_p13 = scmp.lt.s32.totalorder %s842_s25, %s842_s25 }
  0x22   :  { %p849_p0 = por %p848_p13, %p847_p12 }
  0x24   :  { %p850_p1 = pnand %p849_p0, %p843_p11 }
  0x26   :  { %853 = shalt.err (!%p850_p1)
}
  0x27   :  { %s978_s1 = smov 128   ;;  %s979_s26 = smov 8  }
  0x28   :  { %64 = dma.hbm_to_vmem [thread:$0]  %s1123_s3, 4096, %s59_s17, [#allocation10], %s978_s1, %s978_s1, %s979_s26  }
  0x29   :  { %s980_s29 = smov [#allocation3]   ;;  %s854_s10 = scalar_lea.hbm %s1120_s0, 1024 }
  0x2a   :  { %s24_s30 = sshll.u32 %s980_s29, 4  ;;  %p855_p2 = scmp.ne.s32.totalorder %s1120_s0, %s854_s10  ;;  %s25_s30 = int_to_ptr.vmem [resolvable:$true] %s24_s30 }
  0x2b   :  { %p858_p3 = scmp.lt.u32.totalorder %s854_s10, %s1120_s0 }
  0x2d   :  { %p860_p4 = pnand %p858_p3, %p855_p2 }
  0x2f   :  { %863 = shalt.err (!%p860_p4)
}
  0x30   :  { %s864_s14 = scalar_lea.vmem %s25_s30, 1024  ;;  %p869_p6 = scmp.lt.s32.totalorder %s25_s30, %s25_s30 }
  0x31   :  { %p865_p5 = scmp.ne.s32.totalorder %s25_s30, %s864_s14  ;;  %p870_p7 = scmp.lt.s32.totalorder %s864_s14, %s864_s14 }
  0x33   :  { %p871_p8 = por %p870_p7, %p869_p6 }
  0x35   :  { %p872_p9 = pnand %p871_p8, %p865_p5 }
  0x37   :  { %875 = shalt.err (!%p872_p9)
}
  0x38   :  { %s981_s3 = smov 512   ;;  %s982_s15 = smov 32  }
  0x39   :  { %30 = dma.hbm_to_vmem [thread:$0]  %s1120_s0, 1024, %s25_s30, [#allocation4], %s981_s3, %s981_s3, %s982_s15  }
  0x3a   :  { %s983_s18 = smov [#allocation8]   ;;  %s984_s20 = smov [#allocation11]  }
  0x3b   :  { %s49_s19 = sshll.u32 %s983_s18, 4  ;;  %s71_s21 = sshll.u32 %s984_s20, 4  ;;  %s50_s19 = int_to_ptr.vmem [resolvable:$true] %s49_s19  ;;  %s72_s21 = int_to_ptr.vmem [resolvable:$true] %s71_s21 }
  0x3c   :  { %s876_s24 = scalar_lea.hbm %s1122_s2, 32 }
  0x3d   :  { %p877_p10 = scmp.ne.s32.totalorder %s1122_s2, %s876_s24  ;;  %p880_p11 = scmp.lt.u32.totalorder %s876_s24, %s1122_s2 }
  0x3f   :  { %p882_p12 = pnand %p880_p11, %p877_p10 }
  0x41   :  { %885 = shalt.err (!%p882_p12)
}
  0x42   :  { %s886_s0 = scalar_lea.vmem %s50_s19, 32  ;;  %p891_p0 = scmp.lt.s32.totalorder %s50_s19, %s50_s19 }
  0x43   :  { %p887_p13 = scmp.ne.s32.totalorder %s50_s19, %s886_s0  ;;  %p892_p1 = scmp.lt.s32.totalorder %s886_s0, %s886_s0 }
  0x45   :  { %p893_p2 = por %p892_p1, %p891_p0 }
  0x47   :  { %p894_p3 = pnand %p893_p2, %p887_p13 }
  0x49   :  { %897 = shalt.err (!%p894_p3)
}
  0x4a   :  { %52 = dma.hbm_to_vmem [thread:$0]  %s1122_s2, 32, %s50_s19, [#allocation7]  }
  0x4b   :  { %s898_s11 = scalar_lea.hbm %s1124_s4, 16 }
  0x4c   :  { %p899_p4 = scmp.ne.s32.totalorder %s1124_s4, %s898_s11  ;;  %p902_p5 = scmp.lt.u32.totalorder %s898_s11, %s1124_s4 }
  0x4e   :  { %p904_p6 = pnand %p902_p5, %p899_p4 }
  0x50   :  { %907 = shalt.err (!%p904_p6)
}
  0x51   :  { %s908_s3 = scalar_lea.vmem %s72_s21, 16  ;;  %s912_s15 = scalar_lea.vmem %s72_s21, 32 }
  0x52   :  { %p909_p7 = scmp.ne.s32.totalorder %s72_s21, %s908_s3  ;;  %p913_p8 = scmp.lt.s32.totalorder %s72_s21, %s72_s21 }
  0x53   :  { %p914_p9 = scmp.lt.s32.totalorder %s912_s15, %s908_s3 }
  0x55   :  { %p915_p10 = por %p914_p9, %p913_p8 }
  0x57   :  { %p916_p11 = pnand %p915_p10, %p909_p7 }
  0x59   :  { %919 = shalt.err (!%p916_p11)
}
  0x5a   :  { %74 = dma.hbm_to_vmem [thread:$0]  %s1124_s4, 16, %s72_s21, [#allocation10]  }
  0x5b   :  { %s985_s17 = smov [#allocation12]   ;;  %s920_s22 = scalar_lea.hbm %s1125_s5, 16 }
  0x5c   :  { %s81_s18 = sshll.u32 %s985_s17, 4  ;;  %p921_p12 = scmp.ne.s32.totalorder %s1125_s5, %s920_s22  ;;  %s82_s18 = int_to_ptr.vmem [resolvable:$true] %s81_s18 }
  0x5d   :  { %p924_p13 = scmp.lt.u32.totalorder %s920_s22, %s1125_s5 }
  0x5f   :  { %p926_p0 = pnand %p924_p13, %p921_p12 }
  0x61   :  { %929 = shalt.err (!%p926_p0)
}
  0x62   :  { %s930_s28 = scalar_lea.vmem %s82_s18, 16  ;;  %s934_s4 = scalar_lea.vmem %s82_s18, 32 }
  0x63   :  { %p931_p1 = scmp.ne.s32.totalorder %s82_s18, %s930_s28  ;;  %p935_p2 = scmp.lt.s32.totalorder %s82_s18, %s82_s18 }
  0x64   :  { %p936_p3 = scmp.lt.s32.totalorder %s934_s4, %s930_s28 }
  0x66   :  { %p937_p4 = por %p936_p3, %p935_p2 }
  0x68   :  { %p938_p5 = pnand %p937_p4, %p931_p1 }
  0x6a   :  { %941 = shalt.err (!%p938_p5)
}
  0x6b   :  { %84 = dma.hbm_to_vmem [thread:$0]  %s1125_s5, 16, %s82_s18, [#allocation13]  }
  0x6c   :  { %964 = dma.done.wait [#allocation4], 1024  }
  0x6d   :  { %965 = vsyncadd [#allocation4], 4294966272 }
  0x6e   :  { %966 = dma.done.wait [#allocation7], 16416  }
  0x6f   :  { %967 = vsyncadd [#allocation7], 4294950880 }
  0x70   :  { %968 = dma.done.wait [#allocation10], 4112  }
  0x71   :  { %969 = vsyncadd [#allocation10], 4294963184 }
  0x72   :  { %970 = dma.done.wait [#allocation13], 16  }
  0x73   :  { %971 = vsyncadd [#allocation13], 4294967280  ;;  %v114_v1 = vld [vmem:[#allocation6 + $0x8] sm:$0xff]  ;;  %v116_v2 = vld [vmem:[#allocation6 + $0x18] sm:$0xff]  ;;  %vm549_vm0 = vcmask 7168   ;;  %s986_s5 = smov [#allocation14]  }
  0x74   :  { %v113_v3 = vld [vmem:[#allocation6] sm:$0xff]  ;;  %v613_v4 = vpack.c.bf16 %v116_v2, %v114_v1  ;;  %v115_v5 = vld [vmem:[#allocation6 + $0x10] sm:$0xff]  ;;  %v178_v6 = vld [vmem:[#allocation6 + $0x208] sm:$0xff]  ;;  %s557_s0 = sshll.u32 %s986_s5, 4  ;;  %s558_s0 = int_to_ptr.vmem [resolvable:$true] %s557_s0 }
  0x75   :  { %v180_v7 = vld [vmem:[#allocation6 + $0x218] sm:$0xff]  ;;  %v615_v8 = vpack.c.bf16 %v115_v5, %v113_v3  ;;  %v177_v10 = vld [vmem:[#allocation6 + $0x200] sm:$0xff]  ;;  %v179_v11 = vld [vmem:[#allocation6 + $0x210] sm:$0xff]  ;;  %s942_s30 = scalar_lea.vmem %s558_s0, 256  ;;  %p947_p7 = scmp.lt.s32.totalorder %s558_s0, %s558_s0 }
  0x76   :  { %v677_v9 = vpack.c.bf16 %v180_v7, %v178_v6  ;;  %v118_v12 = vld [vmem:[#allocation6 + $0x28] sm:$0xff]  ;;  %614 = vmatprep.subr.bf16.mxu1 %v613_v4  ;;  %v679_v13 = vpack.c.bf16 %v179_v11, %v177_v10  ;;  %v120_v14 = vld [vmem:[#allocation6 + $0x38] sm:$0xff]  ;;  %v117_v15 = vld [vmem:[#allocation6 + $0x20] sm:$0xff]  ;;  %p943_p6 = scmp.ne.s32.totalorder %s558_s0, %s942_s30  ;;  %p948_p8 = scmp.lt.s32.totalorder %s942_s30, %s942_s30 }
  0x77   :  { %v119_v16 = vld [vmem:[#allocation6 + $0x30] sm:$0xff]  ;;  %616 = vmatpush1.bf16.msra.mxu1 %v615_v8  ;;  %v617_v17 = vpack.c.bf16 %v120_v14, %v118_v12  ;;  %v182_v19 = vld [vmem:[#allocation6 + $0x228] sm:$0xff]  ;;  %v184_v20 = vld [vmem:[#allocation6 + $0x238] sm:$0xff] }
  0x78   :  { %678 = vmatprep.subr.bf16.mxu0 %v677_v9  ;;  %v619_v18 = vpack.c.bf16 %v119_v16, %v117_v15  ;;  %v181_v21 = vld [vmem:[#allocation6 + $0x220] sm:$0xff]  ;;  %v681_v22 = vpack.c.bf16 %v184_v20, %v182_v19  ;;  %v183_v23 = vld [vmem:[#allocation6 + $0x230] sm:$0xff]  ;;  %v122_v24 = vld [vmem:[#allocation6 + $0x48] sm:$0xff]  ;;  %p949_p9 = por %p948_p8, %p947_p7 }
  0x79   :  { %680 = vmatpush1.bf16.msra.mxu0 %v679_v13  ;;  %v124_v25 = vld [vmem:[#allocation6 + $0x58] sm:$0xff]  ;;  %618 = vmatprep.subr.bf16.mxu1 %v617_v17  ;;  %v683_v26 = vpack.c.bf16 %v183_v23, %v181_v21  ;;  %v121_v28 = vld [vmem:[#allocation6 + $0x40] sm:$0xff]  ;;  %v123_v29 = vld [vmem:[#allocation6 + $0x50] sm:$0xff] }
  0x7a   :  { %v621_v27 = vpack.c.bf16 %v124_v25, %v122_v24  ;;  %v186_v30 = vld [vmem:[#allocation6 + $0x248] sm:$0xff]  ;;  %682 = vmatprep.subr.bf16.mxu0 %v681_v22  ;;  %v188_v31 = vld [vmem:[#allocation6 + $0x258] sm:$0xff]  ;;  %v185_v32 = vld [vmem:[#allocation6 + $0x240] sm:$0xff]  ;;  %v623_v34 = vpack.c.bf16 %v123_v29, %v121_v28  ;;  %p950_p10 = pnand %p949_p9, %p943_p6 }
  0x7b   :  { %v187_v33 = vld [vmem:[#allocation6 + $0x250] sm:$0xff]  ;;  %620 = vmatpush1.bf16.msra.mxu1 %v619_v18  ;;  %v685_v35 = vpack.c.bf16 %v188_v31, %v186_v30  ;;  %v126_v36 = vld [vmem:[#allocation6 + $0x68] sm:$0xff]  ;;  %v128_v37 = vld [vmem:[#allocation6 + $0x78] sm:$0xff] }
  0x7c   :  { %v125_v38 = vld [vmem:[#allocation6 + $0x60] sm:$0xff]  ;;  %622 = vmatprep.subr.bf16.mxu1 %v621_v27  ;;  %v687_v39 = vpack.c.bf16 %v187_v33, %v185_v32  ;;  %v625_v40 = vpack.c.bf16 %v128_v37, %v126_v36  ;;  %v127_v41 = vld [vmem:[#allocation6 + $0x70] sm:$0xff]  ;;  %v190_v42 = vld [vmem:[#allocation6 + $0x268] sm:$0xff] }
  0x7d   :  { %684 = vmatpush1.bf16.msra.mxu0 %v683_v26  ;;  %v192_v43 = vld [vmem:[#allocation6 + $0x278] sm:$0xff]  ;;  %v189_v45 = vld [vmem:[#allocation6 + $0x260] sm:$0xff]  ;;  %v191_v46 = vld [vmem:[#allocation6 + $0x270] sm:$0xff]  ;;  %v627_v49 = vpack.c.bf16 %v127_v41, %v125_v38 }
  0x7e   :  { %686 = vmatprep.subr.bf16.mxu0 %v685_v35  ;;  %v689_v44 = vpack.c.bf16 %v192_v43, %v190_v42  ;;  %v130_v47 = vld [vmem:[#allocation6 + $0x88] sm:$0xff]  ;;  %v132_v48 = vld [vmem:[#allocation6 + $0x98] sm:$0xff]  ;;  %v691_v52 = vpack.c.bf16 %v191_v46, %v189_v45  ;;  %v129_v54 = vld [vmem:[#allocation6 + $0x80] sm:$0xff] }
  0x7f   :  { %624 = vmatpush1.bf16.msra.mxu1 %v623_v34  ;;  %v194_v50 = vld [vmem:[#allocation6 + $0x288] sm:$0xff]  ;;  %v196_v51 = vld [vmem:[#allocation6 + $0x298] sm:$0xff]  ;;  %v629_v53 = vpack.c.bf16 %v132_v48, %v130_v47  ;;  %v131_v55 = vld [vmem:[#allocation6 + $0x90] sm:$0xff] }
  0x80   :  { %626 = vmatprep.subr.bf16.mxu1 %v625_v40  ;;  %v193_v56 = vld [vmem:[#allocation6 + $0x280] sm:$0xff]  ;;  %v693_v57 = vpack.c.bf16 %v196_v51, %v194_v50  ;;  %v195_v58 = vld [vmem:[#allocation6 + $0x290] sm:$0xff]  ;;  %v134_v59 = vld [vmem:[#allocation6 + $0xa8] sm:$0xff]  ;;  %v631_v63 = vpack.c.bf16 %v131_v55, %v129_v54 }
  0x81   :  { %688 = vmatpush1.bf16.msra.mxu0 %v687_v39  ;;  %v136_v60 = vld [vmem:[#allocation6 + $0xb8] sm:$0xff]  ;;  %v198_v61 = vld [vmem:[#allocation6 + $0x2a8] sm:$0xff]  ;;  %v695_v0 = vpack.c.bf16 %v195_v58, %v193_v56  ;;  %v133_v2 = vld [vmem:[#allocation6 + $0xa0] sm:$0xff] }
  0x82   :  { %690 = vmatprep.subr.bf16.mxu0 %v689_v44  ;;  %v200_v62 = vld [vmem:[#allocation6 + $0x2b8] sm:$0xff]  ;;  %v633_v1 = vpack.c.bf16 %v136_v60, %v134_v59  ;;  %v135_v3 = vld [vmem:[#allocation6 + $0xb0] sm:$0xff]  ;;  %v197_v4 = vld [vmem:[#allocation6 + $0x2a0] sm:$0xff] }
  0x83   :  { %628 = vmatpush1.bf16.msra.mxu1 %v627_v49  ;;  %v697_v5 = vpack.c.bf16 %v200_v62, %v198_v61  ;;  %v199_v6 = vld [vmem:[#allocation6 + $0x2b0] sm:$0xff]  ;;  %v138_v7 = vld [vmem:[#allocation6 + $0xc8] sm:$0xff]  ;;  %v140_v8 = vld [vmem:[#allocation6 + $0xd8] sm:$0xff]  ;;  %v635_v11 = vpack.c.bf16 %v135_v3, %v133_v2 }
  0x84   :  { %630 = vmatprep.subr.bf16.mxu1 %v629_v53  ;;  %v202_v9 = vld [vmem:[#allocation6 + $0x2c8] sm:$0xff]  ;;  %v204_v10 = vld [vmem:[#allocation6 + $0x2d8] sm:$0xff]  ;;  %v699_v12 = vpack.c.bf16 %v199_v6, %v197_v4  ;;  %v637_v13 = vpack.c.bf16 %v140_v8, %v138_v7  ;;  %v137_v14 = vld [vmem:[#allocation6 + $0xc0] sm:$0xff] }
  0x85   :  { %692 = vmatpush1.bf16.msra.mxu0 %v691_v52  ;;  %v139_v15 = vld [vmem:[#allocation6 + $0xd0] sm:$0xff]  ;;  %v201_v16 = vld [vmem:[#allocation6 + $0x2c0] sm:$0xff]  ;;  %v701_v17 = vpack.c.bf16 %v204_v10, %v202_v9  ;;  %v142_v19 = vld [vmem:[#allocation6 + $0xe8] sm:$0xff] }
  0x86   :  { %694 = vmatprep.subr.bf16.mxu0 %v693_v57  ;;  %v203_v18 = vld [vmem:[#allocation6 + $0x2d0] sm:$0xff]  ;;  %v144_v20 = vld [vmem:[#allocation6 + $0xf8] sm:$0xff]  ;;  %v206_v21 = vld [vmem:[#allocation6 + $0x2e8] sm:$0xff]  ;;  %v639_v23 = vpack.c.bf16 %v139_v15, %v137_v14 }
  0x87   :  { %632 = vmatpush1.bf16.msra.mxu1 %v631_v63  ;;  %v208_v22 = vld [vmem:[#allocation6 + $0x2f8] sm:$0xff]  ;;  %v703_v24 = vpack.c.bf16 %v203_v18, %v201_v16  ;;  %v641_v25 = vpack.c.bf16 %v144_v20, %v142_v19  ;;  %v141_v26 = vld [vmem:[#allocation6 + $0xe0] sm:$0xff]  ;;  %v143_v27 = vld [vmem:[#allocation6 + $0xf0] sm:$0xff] }
  0x88   :  { %634 = vmatprep.subr.bf16.mxu1 %v633_v1  ;;  %v205_v28 = vld [vmem:[#allocation6 + $0x2e0] sm:$0xff]  ;;  %v705_v29 = vpack.c.bf16 %v208_v22, %v206_v21  ;;  %v207_v30 = vld [vmem:[#allocation6 + $0x2f0] sm:$0xff]  ;;  %v146_v31 = vld [vmem:[#allocation6 + $0x108] sm:$0xff]  ;;  %v643_v35 = vpack.c.bf16 %v143_v27, %v141_v26 }
  0x89   :  { %696 = vmatpush1.bf16.msra.mxu0 %v695_v0  ;;  %v148_v32 = vld [vmem:[#allocation6 + $0x118] sm:$0xff]  ;;  %v210_v33 = vld [vmem:[#allocation6 + $0x308] sm:$0xff]  ;;  %v707_v36 = vpack.c.bf16 %v207_v30, %v205_v28  ;;  %v145_v38 = vld [vmem:[#allocation6 + $0x100] sm:$0xff] }
  0x8a   :  { %698 = vmatprep.subr.bf16.mxu0 %v697_v5  ;;  %v212_v34 = vld [vmem:[#allocation6 + $0x318] sm:$0xff]  ;;  %v645_v37 = vpack.c.bf16 %v148_v32, %v146_v31  ;;  %v147_v39 = vld [vmem:[#allocation6 + $0x110] sm:$0xff]  ;;  %v209_v40 = vld [vmem:[#allocation6 + $0x300] sm:$0xff] }
  0x8b   :  { %636 = vmatpush1.bf16.msra.mxu1 %v635_v11  ;;  %v709_v41 = vpack.c.bf16 %v212_v34, %v210_v33  ;;  %v211_v42 = vld [vmem:[#allocation6 + $0x310] sm:$0xff]  ;;  %v150_v43 = vld [vmem:[#allocation6 + $0x128] sm:$0xff]  ;;  %v152_v44 = vld [vmem:[#allocation6 + $0x138] sm:$0xff]  ;;  %v647_v47 = vpack.c.bf16 %v147_v39, %v145_v38 }
  0x8c   :  { %638 = vmatprep.subr.bf16.mxu1 %v637_v13  ;;  %v214_v45 = vld [vmem:[#allocation6 + $0x328] sm:$0xff]  ;;  %v216_v46 = vld [vmem:[#allocation6 + $0x338] sm:$0xff]  ;;  %v711_v48 = vpack.c.bf16 %v211_v42, %v209_v40  ;;  %v649_v49 = vpack.c.bf16 %v152_v44, %v150_v43  ;;  %v149_v50 = vld [vmem:[#allocation6 + $0x120] sm:$0xff] }
  0x8d   :  { %700 = vmatpush1.bf16.msra.mxu0 %v699_v12  ;;  %v151_v51 = vld [vmem:[#allocation6 + $0x130] sm:$0xff]  ;;  %v213_v52 = vld [vmem:[#allocation6 + $0x320] sm:$0xff]  ;;  %v713_v53 = vpack.c.bf16 %v216_v46, %v214_v45  ;;  %v154_v55 = vld [vmem:[#allocation6 + $0x148] sm:$0xff] }
  0x8e   :  { %702 = vmatprep.subr.bf16.mxu0 %v701_v17  ;;  %v215_v54 = vld [vmem:[#allocation6 + $0x330] sm:$0xff]  ;;  %v156_v56 = vld [vmem:[#allocation6 + $0x158] sm:$0xff]  ;;  %v218_v57 = vld [vmem:[#allocation6 + $0x348] sm:$0xff]  ;;  %v651_v59 = vpack.c.bf16 %v151_v51, %v149_v50 }
  0x8f   :  { %640 = vmatpush1.bf16.msra.mxu1 %v639_v23  ;;  %v220_v58 = vld [vmem:[#allocation6 + $0x358] sm:$0xff]  ;;  %v715_v60 = vpack.c.bf16 %v215_v54, %v213_v52  ;;  %v653_v61 = vpack.c.bf16 %v156_v56, %v154_v55  ;;  %v153_v62 = vld [vmem:[#allocation6 + $0x140] sm:$0xff]  ;;  %v155_v63 = vld [vmem:[#allocation6 + $0x150] sm:$0xff] }
  0x90   :  { %642 = vmatprep.subr.bf16.mxu1 %v641_v25  ;;  %v217_v0 = vld [vmem:[#allocation6 + $0x340] sm:$0xff]  ;;  %v717_v1 = vpack.c.bf16 %v220_v58, %v218_v57  ;;  %v219_v2 = vld [vmem:[#allocation6 + $0x350] sm:$0xff]  ;;  %v158_v3 = vld [vmem:[#allocation6 + $0x168] sm:$0xff]  ;;  %v655_v7 = vpack.c.bf16 %v155_v63, %v153_v62 }
  0x91   :  { %704 = vmatpush1.bf16.msra.mxu0 %v703_v24  ;;  %v160_v4 = vld [vmem:[#allocation6 + $0x178] sm:$0xff]  ;;  %v222_v5 = vld [vmem:[#allocation6 + $0x368] sm:$0xff]  ;;  %v157_v8 = vld [vmem:[#allocation6 + $0x160] sm:$0xff]  ;;  %v719_v9 = vpack.c.bf16 %v219_v2, %v217_v0 }
  0x92   :  { %706 = vmatprep.subr.bf16.mxu0 %v705_v29  ;;  %v224_v6 = vld [vmem:[#allocation6 + $0x378] sm:$0xff]  ;;  %v657_v10 = vpack.c.bf16 %v160_v4, %v158_v3  ;;  %v159_v11 = vld [vmem:[#allocation6 + $0x170] sm:$0xff]  ;;  %v221_v12 = vld [vmem:[#allocation6 + $0x360] sm:$0xff] }
  0x93   :  { %644 = vmatpush1.bf16.msra.mxu1 %v643_v35  ;;  %v223_v13 = vld [vmem:[#allocation6 + $0x370] sm:$0xff]  ;;  %v721_v14 = vpack.c.bf16 %v224_v6, %v222_v5  ;;  %v162_v15 = vld [vmem:[#allocation6 + $0x188] sm:$0xff]  ;;  %v164_v16 = vld [vmem:[#allocation6 + $0x198] sm:$0xff]  ;;  %v659_v21 = vpack.c.bf16 %v159_v11, %v157_v8 }
  0x94   :  { %646 = vmatprep.subr.bf16.mxu1 %v645_v37  ;;  %v106_v17 = vld [vmem:[#allocation3 + $0x8] sm:$0xff]  ;;  %v228_v19 = vld [vmem:[#allocation6 + $0x398] sm:$0xff]  ;;  %v723_v22 = vpack.c.bf16 %v223_v13, %v221_v12  ;;  %v661_v23 = vpack.c.bf16 %v164_v16, %v162_v15  ;;  %v161_v24 = vld [vmem:[#allocation6 + $0x180] sm:$0xff] }
  0x95   :  { %708 = vmatpush1.bf16.msra.mxu0 %v707_v36  ;;  %v226_v18 = vld [vmem:[#allocation6 + $0x388] sm:$0xff]  ;;  %317 = vmatprep.mubr.f32.mxu1 %v106_v17  ;;  %v108_v20 = vld [vmem:[#allocation3 + $0x18] sm:$0xff]  ;;  %v163_v25 = vld [vmem:[#allocation6 + $0x190] sm:$0xff] }
  0x96   :  { %710 = vmatprep.subr.bf16.mxu0 %v709_v41  ;;  %394 = vmatprep.mubr.f32.mxu0 %v108_v20  ;;  %v225_v26 = vld [vmem:[#allocation6 + $0x380] sm:$0xff]  ;;  %v725_v27 = vpack.c.bf16 %v228_v19, %v226_v18  ;;  %v227_v28 = vld [vmem:[#allocation6 + $0x390] sm:$0xff]  ;;  %v166_v29 = vld [vmem:[#allocation6 + $0x1a8] sm:$0xff]  ;;  %v663_v33 = vpack.c.bf16 %v163_v25, %v161_v24 }
  0x97   :  { %648 = vmatpush1.bf16.msra.mxu1 %v647_v47  ;;  %v168_v30 = vld [vmem:[#allocation6 + $0x1b8] sm:$0xff]  ;;  %v230_v31 = vld [vmem:[#allocation6 + $0x3a8] sm:$0xff]  ;;  %v727_v34 = vpack.c.bf16 %v227_v28, %v225_v26  ;;  %v165_v36 = vld [vmem:[#allocation6 + $0x1a0] sm:$0xff] }
  0x98   :  { %650 = vmatprep.subr.bf16.mxu1 %v649_v49  ;;  %v232_v32 = vld [vmem:[#allocation6 + $0x3b8] sm:$0xff]  ;;  %v665_v35 = vpack.c.bf16 %v168_v30, %v166_v29  ;;  %v167_v37 = vld [vmem:[#allocation6 + $0x1b0] sm:$0xff]  ;;  %v229_v38 = vld [vmem:[#allocation6 + $0x3a0] sm:$0xff] }
  0x99   :  { %712 = vmatpush1.bf16.msra.mxu0 %v711_v48  ;;  %v729_v39 = vpack.c.bf16 %v232_v32, %v230_v31  ;;  %v231_v40 = vld [vmem:[#allocation6 + $0x3b0] sm:$0xff]  ;;  %v170_v41 = vld [vmem:[#allocation6 + $0x1c8] sm:$0xff]  ;;  %v172_v42 = vld [vmem:[#allocation6 + $0x1d8] sm:$0xff]  ;;  %v667_v45 = vpack.c.bf16 %v167_v37, %v165_v36 }
  0x9a   :  { %714 = vmatprep.subr.bf16.mxu0 %v713_v53  ;;  %v234_v43 = vld [vmem:[#allocation6 + $0x3c8] sm:$0xff]  ;;  %v236_v44 = vld [vmem:[#allocation6 + $0x3d8] sm:$0xff]  ;;  %v731_v46 = vpack.c.bf16 %v231_v40, %v229_v38  ;;  %v669_v47 = vpack.c.bf16 %v172_v42, %v170_v41  ;;  %v169_v48 = vld [vmem:[#allocation6 + $0x1c0] sm:$0xff] }
  0x9b   :  { %652 = vmatpush1.bf16.msra.mxu1 %v651_v59  ;;  %v171_v49 = vld [vmem:[#allocation6 + $0x1d0] sm:$0xff]  ;;  %v233_v50 = vld [vmem:[#allocation6 + $0x3c0] sm:$0xff]  ;;  %v733_v51 = vpack.c.bf16 %v236_v44, %v234_v43  ;;  %v174_v53 = vld [vmem:[#allocation6 + $0x1e8] sm:$0xff] }
  0x9c   :  { %654 = vmatprep.subr.bf16.mxu1 %v653_v61  ;;  %v235_v52 = vld [vmem:[#allocation6 + $0x3d0] sm:$0xff]  ;;  %v176_v54 = vld [vmem:[#allocation6 + $0x1f8] sm:$0xff]  ;;  %v238_v55 = vld [vmem:[#allocation6 + $0x3e8] sm:$0xff]  ;;  %v671_v57 = vpack.c.bf16 %v171_v49, %v169_v48 }
  0x9d   :  { %716 = vmatpush1.bf16.msra.mxu0 %v715_v60  ;;  %v240_v56 = vld [vmem:[#allocation6 + $0x3f8] sm:$0xff]  ;;  %v735_v58 = vpack.c.bf16 %v235_v52, %v233_v50  ;;  %v673_v59 = vpack.c.bf16 %v176_v54, %v174_v53  ;;  %v173_v60 = vld [vmem:[#allocation6 + $0x1e0] sm:$0xff]  ;;  %v175_v61 = vld [vmem:[#allocation6 + $0x1f0] sm:$0xff] }
  0x9e   :  { %718 = vmatprep.subr.bf16.mxu0 %v717_v1  ;;  %v737_v62 = vpack.c.bf16 %v240_v56, %v238_v55  ;;  %v237_v63 = vld [vmem:[#allocation6 + $0x3e0] sm:$0xff]  ;;  %v239_v0 = vld [vmem:[#allocation6 + $0x3f0] sm:$0xff]  ;;  %v675_v3 = vpack.c.bf16 %v175_v61, %v173_v60  ;;  %v110_v12 = vld [vmem:[#allocation3 + $0x28] sm:$0xff] }
  0x9f   :  { %656 = vmatpush1.bf16.msra.mxu1 %v655_v7  ;;  %v427_v1 = vld [vmem:[#allocation9 + $0x80] sm:$0xff]  ;;  %v428_v2 = vld [vmem:[#allocation9 + $0x88] sm:$0xff]  ;;  %v739_v4 = vpack.c.bf16 %v239_v0, %v237_v63  ;;  %v429_v8 = vld [vmem:[#allocation9 + $0x90] sm:$0xff] }
  0xa0   :  { %658 = vmatprep.subr.bf16.mxu1 %v657_v10  ;;  %v741_v5 = vpack.c.bf16 %v428_v2, %v427_v1  ;;  %v411_v6 = vld [vmem:[#allocation9] sm:$0xff]  ;;  %v412_v7 = vld [vmem:[#allocation9 + $0x8] sm:$0xff]  ;;  %v413_v16 = vld [vmem:[#allocation9 + $0x10] sm:$0xff] }
  0xa1   :  { %720 = vmatpush1.bf16.msra.mxu0 %v719_v9  ;;  %v430_v9 = vld [vmem:[#allocation9 + $0x98] sm:$0xff]  ;;  %v107_v11 = vld [vmem:[#allocation3 + $0x10] sm:$0xff]  ;;  %v743_v13 = vpack.c.bf16 %v412_v7, %v411_v6  ;;  %v431_v18 = vld [vmem:[#allocation9 + $0xa0] sm:$0xff] }
  0xa2   :  { %722 = vmatprep.subr.bf16.mxu0 %v721_v14  ;;  %v105_v10 = vld [vmem:[#allocation3] sm:$0xff]  ;;  %v112_v14 = vld [vmem:[#allocation3 + $0x38] sm:$0xff]  ;;  %v745_v15 = vpack.c.bf16 %v430_v9, %v429_v8  ;;  %v432_v19 = vld [vmem:[#allocation9 + $0xa8] sm:$0xff] }
  0xa3   :  { %660 = vmatpush1.bf16.msra.mxu1 %v659_v21  ;;  %v414_v17 = vld [vmem:[#allocation9 + $0x18] sm:$0xff]  ;;  %v111_v21 = vld [vmem:[#allocation3 + $0x30] sm:$0xff]  ;;  %v415_v24 = vld [vmem:[#allocation9 + $0x20] sm:$0xff] }
  0xa4   :  { %662 = vmatprep.subr.bf16.mxu1 %v661_v23  ;;  %v109_v20 = vld [vmem:[#allocation3 + $0x20] sm:$0xff]  ;;  %v749_v23 = vpack.c.bf16 %v432_v19, %v431_v18  ;;  %v416_v25 = vld [vmem:[#allocation9 + $0x28] sm:$0xff]  ;;  %v433_v26 = vld [vmem:[#allocation9 + $0xb0] sm:$0xff] }
  0xa5   :  { %724 = vmatpush1.bf16.msra.mxu0 %v723_v22  ;;  %v747_v22 = vpack.c.bf16 %v414_v17, %v413_v16  ;;  %v751_v28 = vpack.c.bf16 %v416_v25, %v415_v24  ;;  %v417_v30 = vld [vmem:[#allocation9 + $0x30] sm:$0xff]  ;;  %v418_v31 = vld [vmem:[#allocation9 + $0x38] sm:$0xff]  ;;  %v435_v32 = vld [vmem:[#allocation9 + $0xc0] sm:$0xff] }
  0xa6   :  { %726 = vmatprep.subr.bf16.mxu0 %v725_v27  ;;  %v434_v27 = vld [vmem:[#allocation9 + $0xb8] sm:$0xff]  ;;  %v419_v36 = vld [vmem:[#allocation9 + $0x40] sm:$0xff]  ;;  %v420_v37 = vld [vmem:[#allocation9 + $0x48] sm:$0xff] }
  0xa7   :  { %664 = vmatpush1.bf16.msra.mxu1 %v663_v33  ;;  %v753_v29 = vpack.c.bf16 %v434_v27, %v433_v26  ;;  %v436_v33 = vld [vmem:[#allocation9 + $0xc8] sm:$0xff]  ;;  %v437_v38 = vld [vmem:[#allocation9 + $0xd0] sm:$0xff]  ;;  %v759_v40 = vpack.c.bf16 %v420_v37, %v419_v36  ;;  %v422_v43 = vld [vmem:[#allocation9 + $0x58] sm:$0xff] }
  0xa8   :  { %666 = vmatprep.subr.bf16.mxu1 %v665_v35  ;;  %v757_v35 = vpack.c.bf16 %v436_v33, %v435_v32  ;;  %v421_v42 = vld [vmem:[#allocation9 + $0x50] sm:$0xff]  ;;  %v423_v48 = vld [vmem:[#allocation9 + $0x60] sm:$0xff]  ;;  %v424_v49 = vld [vmem:[#allocation9 + $0x68] sm:$0xff] }
  0xa9   :  { %728 = vmatpush1.bf16.msra.mxu0 %v727_v34  ;;  %v755_v34 = vpack.c.bf16 %v418_v31, %v417_v30  ;;  %v763_v44 = vpack.c.bf16 %v422_v43, %v421_v42  ;;  %v767_v50 = vpack.c.bf16 %v424_v49, %v423_v48  ;;  %v442_v52 = vld [vmem:[#allocation9 + $0xf8] sm:$0xff]  ;;  %v425_v54 = vld [vmem:[#allocation9 + $0x70] sm:$0xff]  ;;  %v573_v27 = vld [vmem:[#allocation12] ss:$0 sm:$0xff] }
  0xaa   :  { %730 = vmatprep.subr.bf16.mxu0 %v729_v39  ;;  %v438_v39 = vld [vmem:[#allocation9 + $0xd8] sm:$0xff] }
  0xab   :  { %668 = vmatpush1.bf16.msra.mxu1 %v667_v45  ;;  %v761_v41 = vpack.c.bf16 %v438_v39, %v437_v38  ;;  %v439_v45 = vld [vmem:[#allocation9 + $0xe0] sm:$0xff]  ;;  %v426_v55 = vld [vmem:[#allocation9 + $0x78] sm:$0xff] }
  0xac   :  { %670 = vmatprep.subr.bf16.mxu1 %v669_v47  ;;  %v771_v56 = vpack.c.bf16 %v426_v55, %v425_v54  ;;  %v241_v60 = vld [vmem:[#allocation8] sm:$0x3] }
  0xad   :  { %732 = vmatpush1.bf16.msra.mxu0 %v731_v46  ;;  %v440_v46 = vld [vmem:[#allocation9 + $0xe8] sm:$0xff] }
  0xae   :  { %734 = vmatprep.subr.bf16.mxu0 %v733_v51  ;;  %v765_v47 = vpack.c.bf16 %v440_v46, %v439_v45  ;;  %v441_v51 = vld [vmem:[#allocation9 + $0xf0] sm:$0xff] }
  0xaf   :  { %672 = vmatpush1.bf16.msra.mxu1 %v671_v57  ;;  %v769_v53 = vpack.c.bf16 %v442_v52, %v441_v51  ;;  %v243_v57 = vlaneseq }
  0xb0   :  { %674 = vmatprep.subr.bf16.mxu1 %v673_v59 }
  0xb1   :  { %736 = vmatpush1.bf16.msra.mxu0 %v735_v58  ;;  %v244_v58 = vshrl.u32 %v243_v57, 7 }
  0xb2   :  { %738 = vmatprep.subr.bf16.mxu0 %v737_v62 }
  0xb3   :  { %676 = vmatpush1.bf16.msra.mxu1 %v675_v3  ;;  %v245_v59 = vsub.s32 0, %v244_v58  ;;  %v249_v61 = vsub.s32 1, %v244_v58 }
  0xb4   :  { %773 = vmatprep.subr.bf16.mxu1 %v741_v5 }
  0xb5   :  { %740 = vmatpush1.bf16.msra.mxu0 %v739_v4  ;;  %v246_v62 = vrot.slane %v241_v60, %v245_v59  ;;  %v250_v63 = vrot.slane %v241_v60, %v249_v61 }
  0xb6   :  { %742 = vmatprep.subr.bf16.mxu0 %v741_v5  ;;  %318 = vmatmul.mubr.f32.vlgmr.msra.gmra.mrb[0].mxu1 %v105_v10 }
  0xb7   :  { %323 = vmatprep.mubr.f32.mxu1 %v110_v12  ;;  %781 = vmatpush3.bf16.msra.mxu1 %v743_v13 }
  0xb8   :  { %395 = vmatmul.mubr.f32.vlgmr.msra.gmra.mrb[0].mxu0 %v107_v11  ;;  %774 = vmatprep.subr.bf16.mxu1 %v745_v15 }
  0xb9   :  { %400 = vmatprep.mubr.f32.mxu0 %v112_v14  ;;  %744 = vmatpush3.bf16.msra.mxu0 %v743_v13 }
  0xba   :  { %746 = vmatprep.subr.bf16.mxu0 %v745_v15  ;;  %324 = vmatmul.mubr.f32.gmra.mrb[2].mxu1 %v109_v20 }
  0xbb   :  { %782 = vmatpush3.bf16.msra.mxu1 %v747_v22 }
  0xbc   :  { %401 = vmatmul.mubr.f32.gmra.mrb[2].mxu0 %v111_v21  ;;  %775 = vmatprep.subr.bf16.mxu1 %v749_v23 }
  0xbd   :  { %748 = vmatpush3.bf16.msra.mxu0 %v747_v22  ;;  %v572_v22 = vld [vmem:[#allocation11] ss:$0 sm:$0xff] }
  0xbe   :  { %750 = vmatprep.subr.bf16.mxu0 %v749_v23 }
  0xbf   :  { %783 = vmatpush3.bf16.msra.mxu1 %v751_v28 }
  0xc0   :  { %776 = vmatprep.subr.bf16.mxu1 %v753_v29 }
  0xc1   :  { %752 = vmatpush3.bf16.msra.mxu0 %v751_v28 }
  0xc2   :  { %754 = vmatprep.subr.bf16.mxu0 %v753_v29 }
  0xc3   :  { %784 = vmatpush3.bf16.msra.mxu1 %v755_v34 }
  0xc4   :  { %777 = vmatprep.subr.bf16.mxu1 %v757_v35 }
  0xc5   :  { %756 = vmatpush3.bf16.msra.mxu0 %v755_v34  ;;  %v574_v34 = vld [vmem:[#allocation2] ss:$0 sm:$0xff] }
  0xc6   :  { %758 = vmatprep.subr.bf16.mxu0 %v757_v35 }
  0xc7   :  { %785 = vmatpush3.bf16.msra.mxu1 %v759_v40 }
  0xc8   :  { %778 = vmatprep.subr.bf16.mxu1 %v761_v41 }
  0xc9   :  { %760 = vmatpush3.bf16.msra.mxu0 %v759_v40 }
  0xca   :  { %762 = vmatprep.subr.bf16.mxu0 %v761_v41 }
  0xcb   :  { %786 = vmatpush3.bf16.msra.mxu1 %v763_v44 }
  0xcc   :  { %779 = vmatprep.subr.bf16.mxu1 %v765_v47 }
  0xcd   :  { %764 = vmatpush3.bf16.msra.mxu0 %v763_v44 }
  0xce   :  { %766 = vmatprep.subr.bf16.mxu0 %v765_v47 }
  0xcf   :  { %787 = vmatpush3.bf16.msra.mxu1 %v767_v50 }
  0xd0   :  { %780 = vmatprep.subr.bf16.mxu1 %v769_v53 }
  0xd1   :  { %768 = vmatpush3.bf16.msra.mxu0 %v767_v50 }
  0xd2   :  { %770 = vmatprep.subr.bf16.mxu0 %v769_v53 }
  0xd3   :  { %788 = vmatpush3.bf16.msra.mxu1 %v771_v56 }
  0xd5   :  { %772 = vmatpush3.bf16.msra.mxu0 %v771_v56 }
 0x189   :  { %v319_v0 = vpop.f32.mrb[0].mxu1 }
 0x18a   :  { %v320_v1 = vadd.f32 %v319_v0, %v246_v62  ;;  %v321_v2 = vpop.f32.mrb[1].mxu1 }
 0x18b   :  { %v396_v3 = vpop.f32.mrb[0].mxu0  ;;  %v322_v4 = vadd.f32 %v321_v2, %v250_v63 }
 0x18c   :  { %v398_v5 = vpop.f32.mrb[1].mxu0  ;;  %v397_v6 = vadd.f32 %v396_v3, %v320_v1 }
 0x18d   :  { %v399_v7 = vadd.f32 %v398_v5, %v322_v4  ;;  %v325_v8 = vpop.f32.mrb[2].mxu1 }
 0x18e   :  { %v326_v9 = vadd.f32 %v325_v8, %v246_v62  ;;  %v327_v10 = vpop.f32.mrb[3].mxu1  ;;  %v407_v15 = vmax.f32 %v397_v6, 0.0 }
 0x18f   :  { %v402_v11 = vpop.f32.mrb[2].mxu0  ;;  %v408_v12 = vmax.f32 %v399_v7, 0.0  ;;  %v328_v13 = vadd.f32 %v327_v10, %v250_v63 }
 0x190   :  { %v404_v14 = vpop.f32.mrb[3].mxu0  ;;  %v403_v16 = vadd.f32 %v402_v11, %v326_v9 }
 0x191   :  { %v405_v17 = vadd.f32 %v404_v14, %v328_v13  ;;  %514 = vmatprep.mubr.f32.mxu0 %v408_v12 }
 0x192   :  { %515 = vmatmul.mubr.f32.vlgmr.msra.gmra.mrb[4].mxu0 %v407_v15  ;;  %v409_v19 = vmax.f32 %v403_v16, 0.0 }
 0x193   :  { %v410_v18 = vmax.f32 %v405_v17, 0.0 }
 0x195   :  { %519 = vmatprep.mubr.f32.mxu1 %v410_v18 }
 0x196   :  { %520 = vmatmul.mubr.f32.vlgmr.msra.gmra.mrb[4].mxu1 %v409_v19 }
 0x265   :  { %v607_v20 = vpop.f32.mrb[4].mxu0 }
 0x266   :  { %v608_v21 = vpop.f32.mrb[5].mxu0 }
 0x267   :  { %v609_v23 = vadd.f32 %v608_v21, %v607_v20 }
 0x269   :  { %v610_v24 = vpop.f32.mrb[4].mxu1  ;;  %v517_v25 = vadd.f32 %v609_v23, %v572_v22 }
 0x26a   :  { %v611_v26 = vpop.f32.mrb[5].mxu1 }
 0x26b   :  { %v612_v28 = vadd.f32 %v611_v26, %v610_v24  ;;  %v525_v29 = vmax.f32 %v517_v25, 0.0 }
 0x26d   :  { %v522_v30 = vadd.f32 %v612_v28, %v572_v22  ;;  %v534_v31 = vmul.f32 %v573_v27, %v525_v29 }
 0x26f   :  { %v526_v32 = vmax.f32 %v522_v30, 0.0  ;;  %536 = vadd.xlane.f32.xlu0 %v534_v31 }
 0x271   :  { %v535_v33 = vmul.f32 %v573_v27, %v526_v32 }
 0x273   :  { %538 = vadd.xlane.f32.xlu0 %v535_v33 }
 0x2fc   :  { %v537_v35 = vpop.xlane.xlu0 %536 }
 0x2fd   :  { %v547_v36 = vadd.f32 %v574_v34, %v537_v35 }
 0x2ff   :  { %550 = vst.msk [vmem:[#allocation14] sm:$0xff] %vm549_vm0, %v547_v36 }
 0x300   :  { %v539_v37 = vpop.xlane.xlu0 %538 }
 0x301   :  { %v548_v38 = vadd.f32 %v574_v34, %v539_v37 }
 0x303   :  { %551 = vst.msk [vmem:[#allocation14 + $0x8] sm:$0xff] %vm549_vm0, %v548_v38 }
 0x304   :  { %953 = shalt.err (!%p950_p10)
}
 0x305   :  { %s954_s10 = scalar_lea.hbm %s1127_s7, 256 }
 0x306   :  { %p955_p11 = scmp.ne.s32.totalorder %s1127_s7, %s954_s10  ;;  %p958_p12 = scmp.lt.u32.totalorder %s954_s10, %s1127_s7 }
 0x308   :  { %p960_p13 = pnand %p958_p12, %p955_p11 }
 0x30a   :  { %963 = shalt.err (!%p960_p13)
}
 0x30b   :  { %563 = dma.vmem_to_hbm [thread:$0]  %s558_s0, 256, %s1127_s7, [#allocation5], %s978_s1, %s978_s1, %s979_s26  }
 0x30c   :  { %972 = dma.done.wait [#allocation5], 256  }
 0x30d   :  { %973 = vsyncadd [#allocation5], 4294967040 }
 0x30e   :  { %567 = vsyncpa [#allocation4], 1 }
 0x30f   :  { %568 = vsyncpa [#allocation7], 1 }
 0x310   :  { %569 = vsyncpa [#allocation10], 1 }
 0x311   :  { %570 = vsyncpa [#allocation13], 1 }
 0x312   :  { %571 = vsyncpa [#allocation5], 1 }

</bundles_post_ra>
